<compile_context>
chip_gen: v5e
topology: v5e:2x2
jax: 0.10.0
libtpu: 0.0.40
codegen_flags: <defaults>
</compile_context>

<pallas_src>
import functools

import jax
import jax.numpy as jnp
from jax.experimental import pallas as pl
from jax.experimental.pallas import tpu as pltpu


def _encoder_kernel(x_ref, w1_ref, b1_ref, w2_ref, b2_ref, w3_ref, b3_ref, o_ref):
    """One (batch, N-tile) step: 3x Conv1d(k=1) as channel-major matmuls."""
    x = x_ref[0].astype(jnp.float32)                      # (c_in, tn)

    # layer 1: tiny K (= input_dim) -> keep f32; BN already folded into w1/b1.
    h1 = jnp.dot(w1_ref[...], x, preferred_element_type=jnp.float32) + b1_ref[...]
    h1 = jnp.maximum(h1, 0.0)                             # (c1, tn)

    # layer 2: dominant matmul, bf16 on the MXU with f32 accumulation.
    h2 = jnp.dot(w2_ref[...], h1.astype(jnp.bfloat16),
                 preferred_element_type=jnp.float32) + b2_ref[...]
    h2 = jnp.maximum(h2, 0.0)                             # (c2, tn)

    # layer 3: no BN / ReLU (bias was init'd to 0 in the PyTorch module).
    out = jnp.dot(w3_ref[...], h2.astype(jnp.bfloat16),
                  preferred_element_type=jnp.float32) + b3_ref[...]
    o_ref[0] = out.astype(o_ref.dtype)                    # (feature_dim, tn)


@functools.partial(jax.jit, static_argnames=("tn",))
def encoder_forward(pts, params, *, tn=4096):
    """pts: (B, C_in, N) float32 (PyTorch NCW).  Returns (B, feature_dim, N)."""
    B, c_in, N = pts.shape
    c1 = params["w1t"].shape[0]
    c2 = params["w2t"].shape[0]
    feature_dim = params["w3t"].shape[0]

    # Lane tile along N: always a 128-multiple so every store is an unmasked,
    # lane-dense vst.  Small N -> one padded tile; large N -> tn-sized tiles.
    tile_cap = max(128, (tn // 128) * 128)
    N128 = ((N + 127) // 128) * 128
    if N128 <= tile_cap:
        tn_eff, Np = N128, N128
    else:
        tn_eff = tile_cap
        Np = ((N + tn_eff - 1) // tn_eff) * tn_eff

    x = pts if Np == N else jnp.pad(pts, ((0, 0), (0, 0), (0, Np - N)))

    const = lambda b, j: (0, 0)   # weights/biases: same (VMEM-resident) block every step

    out = pl.pallas_call(
        _encoder_kernel,
        out_shape=jax.ShapeDtypeStruct((B, feature_dim, Np), pts.dtype),
        grid_spec=pltpu.PrefetchScalarGridSpec(
            num_scalar_prefetch=0,
            grid=(B, Np // tn_eff),
            in_specs=[
                pl.BlockSpec((1, c_in, tn_eff), lambda b, j: (b, 0, j)),  # x tile (NCW)
                pl.BlockSpec((c1, c_in), const),          # w1  (f32, BN folded)
                pl.BlockSpec((c1, 1), const),             # b1  (f32, BN folded)
                pl.BlockSpec((c2, c1), const),            # w2  (bf16, BN folded)
                pl.BlockSpec((c2, 1), const),             # b2  (f32, BN folded)
                pl.BlockSpec((feature_dim, c2), const),   # w3  (bf16)
                pl.BlockSpec((feature_dim, 1), const),    # b3  (f32)
            ],
            out_specs=pl.BlockSpec((1, feature_dim, tn_eff), lambda b, j: (b, 0, j)),
        ),
        compiler_params=pltpu.CompilerParams(
            dimension_semantics=("parallel", "parallel")),
    )(
        x,
        params["w1t"], params["b1"],
        params["w2t"], params["b2"],
        params["w3t"], params["b3"],
    )

    return out if Np == N else out[:, :, :N]


def init_encoder_params(key, input_dim, feature_dim, layers=(256, 128)):
    """Deterministic synthetic parameters matching the PyTorch module.

    Conv1d(k=1) weight (out, in, 1) is stored squeezed as (out, in) - exactly
    the channel-major layout the kernel consumes.  BatchNorm1d (eval mode,
    default running stats: mean=0, var=1, gamma=1, beta=0, eps=1e-5) is folded
    into the conv weights and biases.
    """
    channels = [input_dim] + list(layers) + [feature_dim]
    eps = 1e-5
    ks = jax.random.split(key, 6)

    def conv_init(kw, kb, cin, cout):
        # PyTorch Conv1d default init: U(-bound, bound), bound = 1/sqrt(cin*k)
        bound = 1.0 / jnp.sqrt(jnp.float32(cin))
        w = jax.random.uniform(kw, (cout, cin), jnp.float32, -bound, bound)
        b = jax.random.uniform(kb, (cout,), jnp.float32, -bound, bound)
        return w, b

    w1, b1 = conv_init(ks[0], ks[1], channels[0], channels[1])
    w2, b2 = conv_init(ks[2], ks[3], channels[1], channels[2])
    w3, _ = conv_init(ks[4], ks[5], channels[2], channels[3])
    b3 = jnp.zeros((channels[3],), jnp.float32)   # nn.init.constant_(bias, 0.0)

    def fold_bn(w, b, c):
        gamma = jnp.ones((c,), jnp.float32)
        beta = jnp.zeros((c,), jnp.float32)
        mean = jnp.zeros((c,), jnp.float32)
        var = jnp.ones((c,), jnp.float32)
        s = gamma / jnp.sqrt(var + eps)
        t = beta - mean * s
        return w * s[:, None], b * s + t

    w1, b1 = fold_bn(w1, b1, channels[1])
    w2, b2 = fold_bn(w2, b2, channels[2])

    return {
        "w1t": w1,                              # (256, c_in)  f32 (K is tiny)
        "w2t": w2.astype(jnp.bfloat16),         # (128, 256)   bf16 -> MXU peak
        "w3t": w3.astype(jnp.bfloat16),         # (feat, 128)  bf16
        "b1": b1[:, None],                      # (256, 1) f32
        "b2": b2[:, None],                      # (128, 1) f32
        "b3": b3[:, None],                      # (feat, 1) f32
    }


def _reference_forward(pts, params):
    """Plain-JAX reference mirroring the kernel's precision (bf16 matmuls 2/3)."""
    x = pts.astype(jnp.float32)                                    # (B, c_in, N)
    w1 = params["w1t"].astype(jnp.float32)
    h1 = jnp.einsum("oc,bcn->bon", w1, x) + params["b1"][None]
    h1 = jnp.maximum(h1, 0.0)
    w2 = params["w2t"].astype(jnp.float32)
    h2 = jnp.einsum("oc,bcn->bon", w2,
                    h1.astype(jnp.bfloat16).astype(jnp.float32)) + params["b2"][None]
    h2 = jnp.maximum(h2, 0.0)
    w3 = params["w3t"].astype(jnp.float32)
    o = jnp.einsum("oc,bcn->bon", w3,
                   h2.astype(jnp.bfloat16).astype(jnp.float32)) + params["b3"][None]
    return o


if __name__ == "__main__":
    key = jax.random.PRNGKey(0)
    k_param, k_data = jax.random.split(key)

    input_dim = 4       # e.g. waypoint (x, y, heading, t)
    feature_dim = 32
    B, N = 2, 16        # batch of 2, 16 waypoints

    params = init_encoder_params(k_param, input_dim, feature_dim)
    pts = jax.random.normal(k_data, (B, input_dim, N), jnp.float32)

    out = jax.block_until_ready(encoder_forward(pts, params))
    ref = _reference_forward(pts, params)

    assert out.shape == (B, feature_dim, N)
    assert jnp.allclose(out, ref, atol=1e-2, rtol=1e-2), \
        float(jnp.max(jnp.abs(out - ref)))

    print("KERNEL_OK")
</pallas_src>

<mosaic_0001>
module attributes {stable_mosaic.version = 11 : i64} {
  func.func @_encoder_kernel(%arg0: i32, %arg1: i32, %arg2: memref<1x4x128xf32, #tpu.memory_space<vmem>>, %arg3: memref<256x4xf32, #tpu.memory_space<vmem>>, %arg4: memref<256x1xf32, #tpu.memory_space<vmem>>, %arg5: memref<128x256xbf16, #tpu.memory_space<vmem>>, %arg6: memref<128x1xf32, #tpu.memory_space<vmem>>, %arg7: memref<32x128xbf16, #tpu.memory_space<vmem>>, %arg8: memref<32x1xf32, #tpu.memory_space<vmem>>, %arg9: memref<1x32x128xf32, #tpu.memory_space<vmem>>) attributes {dimension_semantics = [#tpu.dimension_semantics<parallel>, #tpu.dimension_semantics<parallel>], iteration_bounds = array<i64: 2, 1>, scalar_prefetch = 0 : i64, scratch_operands = 0 : i64, tpu.core_type = #tpu.core_type<tc>, window_params = [{transform_indices = @transform_0, window_bounds = array<i64: 1, 4, 128>}, {pipeline_mode = #tpu.pipeline_mode<synchronous>, transform_indices = @transform_1, window_bounds = array<i64: 256, 4>}, {pipeline_mode = #tpu.pipeline_mode<synchronous>, transform_indices = @transform_2, window_bounds = array<i64: 256, 1>}, {pipeline_mode = #tpu.pipeline_mode<synchronous>, transform_indices = @transform_3, window_bounds = array<i64: 128, 256>}, {pipeline_mode = #tpu.pipeline_mode<synchronous>, transform_indices = @transform_4, window_bounds = array<i64: 128, 1>}, {pipeline_mode = #tpu.pipeline_mode<synchronous>, transform_indices = @transform_5, window_bounds = array<i64: 32, 128>}, {pipeline_mode = #tpu.pipeline_mode<synchronous>, transform_indices = @transform_6, window_bounds = array<i64: 32, 1>}, {transform_indices = @transform_7, window_bounds = array<i64: 1, 32, 128>}]} {
    %c0 = arith.constant 0 : index
    %c0_0 = arith.constant 0 : index
    %c0_1 = arith.constant 0 : index
    %0 = vector.load %arg2[%c0, %c0_0, %c0_1] : memref<1x4x128xf32, #tpu.memory_space<vmem>>, vector<1x4x128xf32>
    %1 = vector.shape_cast %0 : vector<1x4x128xf32> to vector<4x128xf32>
    %c0_2 = arith.constant 0 : index
    %c0_3 = arith.constant 0 : index
    %2 = vector.load %arg3[%c0_2, %c0_3] : memref<256x4xf32, #tpu.memory_space<vmem>>, vector<256x4xf32>
    %cst = arith.constant dense<0.000000e+00> : vector<256x128xf32>
    %3 = tpu.matmul %2, %1, %cst {dimension_numbers = #tpu.dot_dimension_numbers<[1], [0], [0], [1], [0, 0, 1, 1], [], []>} : vector<256x4xf32>, vector<4x128xf32>, vector<256x128xf32> -> vector<256x128xf32>
    %c0_4 = arith.constant 0 : index
    %c0_5 = arith.constant 0 : index
    %4 = vector.load %arg4[%c0_4, %c0_5] : memref<256x1xf32, #tpu.memory_space<vmem>>, vector<256x1xf32>
    %5 = vector.broadcast %4 : vector<256x1xf32> to vector<256x128xf32>
    %6 = arith.addf %3, %5 : vector<256x128xf32>
    %cst_6 = arith.constant 0.000000e+00 : f32
    %7 = vector.broadcast %cst_6 : f32 to vector<256x128xf32>
    %8 = arith.maximumf %6, %7 : vector<256x128xf32>
    %c0_7 = arith.constant 0 : index
    %c0_8 = arith.constant 0 : index
    %9 = vector.load %arg5[%c0_7, %c0_8] : memref<128x256xbf16, #tpu.memory_space<vmem>>, vector<128x256xbf16>
    %10 = arith.truncf %8 : vector<256x128xf32> to vector<256x128xbf16>
    %cst_9 = arith.constant dense<0.000000e+00> : vector<128x128xf32>
    %11 = tpu.matmul %9, %10, %cst_9 {dimension_numbers = #tpu.dot_dimension_numbers<[1], [0], [0], [1], [0, 0, 1, 1], [], []>} : vector<128x256xbf16>, vector<256x128xbf16>, vector<128x128xf32> -> vector<128x128xf32>
    %c0_10 = arith.constant 0 : index
    %c0_11 = arith.constant 0 : index
    %12 = vector.load %arg6[%c0_10, %c0_11] : memref<128x1xf32, #tpu.memory_space<vmem>>, vector<128x1xf32>
    %13 = vector.broadcast %12 : vector<128x1xf32> to vector<128x128xf32>
    %14 = arith.addf %11, %13 : vector<128x128xf32>
    %cst_12 = arith.constant 0.000000e+00 : f32
    %15 = vector.broadcast %cst_12 : f32 to vector<128x128xf32>
    %16 = arith.maximumf %14, %15 : vector<128x128xf32>
    %c0_13 = arith.constant 0 : index
    %c0_14 = arith.constant 0 : index
    %17 = vector.load %arg7[%c0_13, %c0_14] : memref<32x128xbf16, #tpu.memory_space<vmem>>, vector<32x128xbf16>
    %18 = arith.truncf %16 : vector<128x128xf32> to vector<128x128xbf16>
    %cst_15 = arith.constant dense<0.000000e+00> : vector<32x128xf32>
    %19 = tpu.matmul %17, %18, %cst_15 {dimension_numbers = #tpu.dot_dimension_numbers<[1], [0], [0], [1], [0, 0, 1, 1], [], []>} : vector<32x128xbf16>, vector<128x128xbf16>, vector<32x128xf32> -> vector<32x128xf32>
    %c0_16 = arith.constant 0 : index
    %c0_17 = arith.constant 0 : index
    %20 = vector.load %arg8[%c0_16, %c0_17] : memref<32x1xf32, #tpu.memory_space<vmem>>, vector<32x1xf32>
    %21 = vector.broadcast %20 : vector<32x1xf32> to vector<32x128xf32>
    %22 = arith.addf %19, %21 : vector<32x128xf32>
    %c0_18 = arith.constant 0 : index
    %c0_19 = arith.constant 0 : index
    %c0_20 = arith.constant 0 : index
    %23 = vector.load %arg9[%c0_18, %c0_19, %c0_20] : memref<1x32x128xf32, #tpu.memory_space<vmem>>, vector<1x32x128xf32>
    %24 = vector.shape_cast %23 : vector<1x32x128xf32> to vector<32x128xf32>
    %25 = vector.shape_cast %22 : vector<32x128xf32> to vector<1x32x128xf32>
    tpu.vector_store %arg9[%c0_18, %c0_19, %c0_20], %25 {strides = array<i32>} : memref<1x32x128xf32, #tpu.memory_space<vmem>>, vector<1x32x128xf32>,
    return
  }
  func.func @transform_0(%arg0: i32, %arg1: i32) -> (i32, i32, i32) {
    %c0_i32 = arith.constant 0 : i32
    %c0_i32_0 = arith.constant 0 : i32
    return %arg0, %c0_i32, %arg1 : i32, i32, i32
  }
  func.func @transform_1(%arg0: i32, %arg1: i32) -> (i32, i32) {
    %c0_i32 = arith.constant 0 : i32
    %c0_i32_0 = arith.constant 0 : i32
    %c0_i32_1 = arith.constant 0 : i32
    return %c0_i32, %c0_i32_0 : i32, i32
  }
  func.func @transform_2(%arg0: i32, %arg1: i32) -> (i32, i32) {
    %c0_i32 = arith.constant 0 : i32
    %c0_i32_0 = arith.constant 0 : i32
    %c0_i32_1 = arith.constant 0 : i32
    return %c0_i32, %c0_i32_0 : i32, i32
  }
  func.func @transform_3(%arg0: i32, %arg1: i32) -> (i32, i32) {
    %c0_i32 = arith.constant 0 : i32
    %c0_i32_0 = arith.constant 0 : i32
    %c0_i32_1 = arith.constant 0 : i32
    return %c0_i32, %c0_i32_0 : i32, i32
  }
  func.func @transform_4(%arg0: i32, %arg1: i32) -> (i32, i32) {
    %c0_i32 = arith.constant 0 : i32
    %c0_i32_0 = arith.constant 0 : i32
    %c0_i32_1 = arith.constant 0 : i32
    return %c0_i32, %c0_i32_0 : i32, i32
  }
  func.func @transform_5(%arg0: i32, %arg1: i32) -> (i32, i32) {
    %c0_i32 = arith.constant 0 : i32
    %c0_i32_0 = arith.constant 0 : i32
    %c0_i32_1 = arith.constant 0 : i32
    return %c0_i32, %c0_i32_0 : i32, i32
  }
  func.func @transform_6(%arg0: i32, %arg1: i32) -> (i32, i32) {
    %c0_i32 = arith.constant 0 : i32
    %c0_i32_0 = arith.constant 0 : i32
    %c0_i32_1 = arith.constant 0 : i32
    return %c0_i32, %c0_i32_0 : i32, i32
  }
  func.func @transform_7(%arg0: i32, %arg1: i32) -> (i32, i32, i32) {
    %c0_i32 = arith.constant 0 : i32
    %c0_i32_0 = arith.constant 0 : i32
    return %arg0, %c0_i32, %arg1 : i32, i32, i32
  }
}

</mosaic_0001>

<bundles_post_ra>
// kernel: encoder_forward.1
= control target key start
LH: loop header
LB: loop body
LE: loop exit
PB: predicated region body
PF: predicated region fallthrough
CT: control target
= control target key end

     0   :  { %s1479_s24 = smov 0   ;;  %s1481_s25 = smov 0   ;;  %s2010_s0 = inlined_call_operand.vmem [shape: f32[2,4,128], index: 0, kind: input, shape index: {}]   ;;  %s2011_s1 = inlined_call_operand.vmem [shape: f32[256,4], index: 1, kind: input, shape index: {}]   ;;  %s2012_s2 = inlined_call_operand.vmem [shape: f32[256,1], index: 2, kind: input, shape index: {}]   ;;  %s2013_s3 = inlined_call_operand.vmem [shape: bf16[128,256], index: 3, kind: input, shape index: {}]   ;;  %s2014_s4 = inlined_call_operand.vmem [shape: f32[128,1], index: 4, kind: input, shape index: {}]   ;;  %s2015_s5 = inlined_call_operand.vmem [shape: bf16[32,128], index: 5, kind: input, shape index: {}]   ;;  %s2016_s6 = inlined_call_operand.vmem [shape: f32[32,1], index: 6, kind: input, shape index: {}]   ;;  %s2017_s7 = inlined_call_operand.vmem [shape: f32[2,32,128], index: 7, kind: output, shape index: {}]  }
   0x1   :  { %s1483_s26 = smov 0  }
   0x2 LB: > { %s29_s27 = sadd.s32 1, %s1432_s25  ;;  %p1255_p0 = scmp.ge.s32.totalorder %s1436_s26, 1  ;;  %s1436_s26 = sphi %s1483_s26, %s17_s26   ;;  %s1432_s25 = sphi %s1481_s25, %s2019_s25   ;;  %s1428_s24 = sphi %s1479_s24, %s2018_s24  }
   0x3   : > { %p31_p1 = scmp.ge.s32.totalorder %s29_s27, 2  ;;  %p255_p2 = scmp.lt.s32.totalorder %s1436_s26, 3 }
   0x5   : > { %s2021_s27 = smov (%p31_p1, %s29_s27), 0  ;;  %p256_p3 = pnand %p1255_p0, %p255_p2 }
   0x6   : > { %p292_p4 = scmp.lt.s32.totalorder (!%p256_p3), %s1428_s24, 1 }
   0x7   : > { %259 = sbr.rel (%p256_p3) target bundleno = 748 (0x2ec), region = 48 }
   0xc   : > { %v370_v0 = vld [vmem:[%s2012_s2 + $0xf0] sm:$0xff]  ;;  %v368_v1 = vld [vmem:[%s2012_s2 + $0xe0] sm:$0xff]  ;;  %v1438_v3 = vmov 0   ;;  %s2023_s24 = smov (!%p292_p4, %s1428_s24), 1  ;;  %vm629_vm0 = vcmask 1043456   ;;  %vm532_vm1 = vcmask 31744  }
   0xd   : > { %v354_v2 = vld [vmem:[%s2012_s2 + $0x70] sm:$0xff]  ;;  %1413 = vset.pattern.permute.xlu2 %v1438_v3  ;;  %1412 = vset.pattern.permute.xlu1 %v1438_v3  ;;  %s1256_s11 = sshll.u32 %s2023_s24, 2  ;;  %v308_v4 = vld [vmem:[%s2011_s1] sm:$0xff]  ;;  %v327_v5 = vld [vmem:[%s2011_s1 + $0x98] sm:$0xff]  ;;  %s1366_s17 = sshll.u32 %s2023_s24, 5 }
   0xe   : > { %1411 = vset.pattern.permute.xlu0 %v1438_v3  ;;  %514 = vperm.xlu2 %1413, %v368_v1   ;;  %s298_s14 = scalar_lea.vmem %s2010_s0, %s1256_s11  ;;  %v369_v7 = vld [vmem:[%s2012_s2 + $0xe8] sm:$0xff]  ;;  %v371_v8 = vld [vmem:[%s2012_s2 + $0xf8] sm:$0xff]  ;;  %v328_v11 = vld [vmem:[%s2011_s1 + $0xa0] sm:$0xff]  ;;  %s306_s20 = scalar_lea.vmem %s2017_s7, %s1366_s17 }
   0xf   : > { %524 = vperm.xlu0 %1411, %v370_v0   ;;  %444 = vperm.xlu1 %1412, %v354_v2   ;;  %v307_v6 = vld [vmem:[%s298_s14] sm:$0xf]  ;;  %v355_v9 = vld [vmem:[%s2012_s2 + $0x78] sm:$0xff]  ;;  %v309_v10 = vld [vmem:[%s2011_s1 + $0x8] sm:$0xff] }
  0x10   : > { %1259 = vmatpush.msk.msra.mxu0 %vm629_vm0, %v307_v6  ;;  %1385 = vmatpush.msk.msra.mxu3 %vm629_vm0, %v307_v6  ;;  %v366_v12 = vld [vmem:[%s2012_s2 + $0xd0] sm:$0xff]  ;;  %v353_v13 = vld [vmem:[%s2012_s2 + $0x68] sm:$0xff]  ;;  %v352_v14 = vld [vmem:[%s2012_s2 + $0x60] sm:$0xff] }
  0x11   : > { %1260 = vmatmul.msk.f32.vlgmr.msra.gmra.mxu0 %vm532_vm1, %v308_v4  ;;  %1279 = vmatmul.msk.f32.vlgmr.msra.gmra.mxu3 %vm532_vm1, %v327_v5  ;;  %v310_v15 = vld [vmem:[%s2011_s1 + $0x10] sm:$0xff]  ;;  %v329_v16 = vld [vmem:[%s2011_s1 + $0xa8] sm:$0xff]  ;;  %v351_v17 = vld [vmem:[%s2012_s2 + $0x58] sm:$0xff] }
  0x12   : > { %v367_v18 = vld [vmem:[%s2012_s2 + $0xd8] sm:$0xff]  ;;  %v350_v19 = vld [vmem:[%s2012_s2 + $0x50] sm:$0xff]  ;;  %v348_v22 = vld [vmem:[%s2012_s2 + $0x40] sm:$0xff] }
  0x13   : > { %v311_v20 = vld [vmem:[%s2011_s1 + $0x18] sm:$0xff]  ;;  %v330_v21 = vld [vmem:[%s2011_s1 + $0xb0] sm:$0xff]  ;;  %v364_v23 = vld [vmem:[%s2012_s2 + $0xc0] sm:$0xff] }
  0x14   : > { %v365_v24 = vld [vmem:[%s2012_s2 + $0xc8] sm:$0xff]  ;;  %v312_v25 = vld [vmem:[%s2011_s1 + $0x20] sm:$0xff]  ;;  %v331_v26 = vld [vmem:[%s2011_s1 + $0xb8] sm:$0xff] }
  0x15   : > { %v363_v27 = vld [vmem:[%s2012_s2 + $0xb8] sm:$0xff]  ;;  %v362_v28 = vld [vmem:[%s2012_s2 + $0xb0] sm:$0xff]  ;;  %v349_v29 = vld [vmem:[%s2012_s2 + $0x48] sm:$0xff] }
  0x16   : > { %519 = vperm.xlu2 %1413, %v369_v7   ;;  %v313_v30 = vld [vmem:[%s2011_s1 + $0x28] sm:$0xff]  ;;  %v332_v31 = vld [vmem:[%s2011_s1 + $0xc0] sm:$0xff]  ;;  %v347_v33 = vld [vmem:[%s2012_s2 + $0x38] sm:$0xff] }
  0x17   : > { %529 = vperm.xlu0 %1411, %v371_v8   ;;  %449 = vperm.xlu1 %1412, %v355_v9   ;;  %v360_v32 = vld [vmem:[%s2012_s2 + $0xa0] sm:$0xff]  ;;  %v346_v34 = vld [vmem:[%s2012_s2 + $0x30] sm:$0xff]  ;;  %v333_v36 = vld [vmem:[%s2011_s1 + $0xc8] sm:$0xff] }
  0x18   : > { %v314_v35 = vld [vmem:[%s2011_s1 + $0x30] sm:$0xff]  ;;  %v345_v37 = vld [vmem:[%s2012_s2 + $0x28] sm:$0xff]  ;;  %v344_v39 = vld [vmem:[%s2012_s2 + $0x20] sm:$0xff] }
  0x19   : > { %1261 = vmatmul.msk.f32.gmra.mxu0 %vm532_vm1, %v309_v10  ;;  %1280 = vmatmul.msk.f32.gmra.mxu3 %vm532_vm1, %v328_v11  ;;  %v361_v38 = vld [vmem:[%s2012_s2 + $0xa8] sm:$0xff]  ;;  %v315_v40 = vld [vmem:[%s2011_s1 + $0x38] sm:$0xff]  ;;  %v334_v41 = vld [vmem:[%s2011_s1 + $0xd0] sm:$0xff] }
  0x1a   : > { %v342_v42 = vld [vmem:[%s2012_s2 + $0x10] sm:$0xff]  ;;  %v359_v44 = vld [vmem:[%s2012_s2 + $0x98] sm:$0xff]  ;;  %v316_v45 = vld [vmem:[%s2011_s1 + $0x40] sm:$0xff] }
  0x1b   : > { %v358_v43 = vld [vmem:[%s2012_s2 + $0x90] sm:$0xff]  ;;  %v335_v46 = vld [vmem:[%s2011_s1 + $0xd8] sm:$0xff]  ;;  %v357_v47 = vld [vmem:[%s2012_s2 + $0x88] sm:$0xff] }
  0x1c   : > { %v356_v48 = vld [vmem:[%s2012_s2 + $0x80] sm:$0xff]  ;;  %v343_v49 = vld [vmem:[%s2012_s2 + $0x18] sm:$0xff]  ;;  %v317_v50 = vld [vmem:[%s2011_s1 + $0x48] sm:$0xff] }
  0x1d   : > { %v336_v51 = vld [vmem:[%s2011_s1 + $0xe0] sm:$0xff]  ;;  %v824_v52 = vld [vmem:[%s2014_s4 + $0x70] sm:$0xff]  ;;  %v341_v53 = vld [vmem:[%s2012_s2 + $0x8] sm:$0xff] }
  0x1e   : > { %504 = vperm.xlu2 %1413, %v366_v12   ;;  %v340_v54 = vld [vmem:[%s2012_s2] sm:$0xff]  ;;  %v318_v55 = vld [vmem:[%s2011_s1 + $0x50] sm:$0xff]  ;;  %v337_v56 = vld [vmem:[%s2011_s1 + $0xe8] sm:$0xff] }
  0x1f   : > { %439 = vperm.xlu1 %1412, %v353_v13   ;;  %434 = vperm.xlu0 %1411, %v352_v14   ;;  %v823_v57 = vld [vmem:[%s2014_s4 + $0x68] sm:$0xff]  ;;  %v822_v58 = vld [vmem:[%s2014_s4 + $0x60] sm:$0xff]  ;;  %v825_v59 = vld [vmem:[%s2014_s4 + $0x78] sm:$0xff] }
  0x20   : > { %v319_v60 = vld [vmem:[%s2011_s1 + $0x58] sm:$0xff]  ;;  %v338_v61 = vld [vmem:[%s2011_s1 + $0xf0] sm:$0xff]  ;;  %v818_v62 = vld [vmem:[%s2014_s4 + $0x40] sm:$0xff] }
  0x21   : > { %1262 = vmatmul.msk.f32.gmra.mxu0 %vm532_vm1, %v310_v15  ;;  %1281 = vmatmul.msk.f32.gmra.mxu3 %vm532_vm1, %v329_v16  ;;  %v821_v63 = vld [vmem:[%s2014_s4 + $0x58] sm:$0xff]  ;;  %v820_v0 = vld [vmem:[%s2014_s4 + $0x50] sm:$0xff]  ;;  %v320_v1 = vld [vmem:[%s2011_s1 + $0x60] sm:$0xff] }
  0x22   : > { %v339_v2 = vld [vmem:[%s2011_s1 + $0xf8] sm:$0xff]  ;;  %v816_v5 = vld [vmem:[%s2014_s4 + $0x30] sm:$0xff]  ;;  %v819_v6 = vld [vmem:[%s2014_s4 + $0x48] sm:$0xff] }
  0x23   : > { %v817_v3 = vld [vmem:[%s2014_s4 + $0x38] sm:$0xff]  ;;  %v321_v7 = vld [vmem:[%s2011_s1 + $0x68] sm:$0xff]  ;;  %v812_v8 = vld [vmem:[%s2014_s4 + $0x10] sm:$0xff] }
  0x24   : > { %v815_v9 = vld [vmem:[%s2014_s4 + $0x28] sm:$0xff]  ;;  %v814_v10 = vld [vmem:[%s2014_s4 + $0x20] sm:$0xff]  ;;  %v322_v14 = vld [vmem:[%s2011_s1 + $0x70] sm:$0xff] }
  0x25   : > { %v811_v15 = vld [vmem:[%s2014_s4 + $0x8] sm:$0xff]  ;;  %v810_v16 = vld [vmem:[%s2014_s4] sm:$0xff] }
  0x26   : > { %429 = vperm.xlu2 %1413, %v351_v17   ;;  %v813_v17 = vld [vmem:[%s2014_s4 + $0x18] sm:$0xff] }
  0x27   : > { %509 = vperm.xlu0 %1411, %v367_v18   ;;  %424 = vperm.xlu1 %1412, %v350_v19  }
  0x29   : > { %1263 = vmatmul.msk.f32.gmra.mxu0 %vm532_vm1, %v311_v20  ;;  %1282 = vmatmul.msk.f32.gmra.mxu3 %vm532_vm1, %v330_v21  ;;  %v323_v21 = vld [vmem:[%s2011_s1 + $0x78] sm:$0xff] }
  0x2e   : > { %414 = vperm.xlu2 %1413, %v348_v22   ;;  %v1114_v22 = vld [vmem:[%s2016_s6 + $0x10] sm:$0xff] }
  0x2f   : > { %494 = vperm.xlu0 %1411, %v364_v23   ;;  %499 = vperm.xlu1 %1412, %v365_v24   ;;  %v1113_v23 = vld [vmem:[%s2016_s6 + $0x8] sm:$0xff]  ;;  %v1112_v24 = vld [vmem:[%s2016_s6] sm:$0xff] }
  0x31   : > { %1264 = vmatmul.msk.f32.gmra.mxu0 %vm532_vm1, %v312_v25  ;;  %1283 = vmatmul.msk.f32.gmra.mxu3 %vm532_vm1, %v331_v26 }
  0x36   : > { %489 = vperm.xlu2 %1413, %v363_v27   ;;  %v324_v27 = vld [vmem:[%s2011_s1 + $0x80] sm:$0xff] }
  0x37   : > { %484 = vperm.xlu1 %1412, %v362_v28   ;;  %419 = vperm.xlu0 %1411, %v349_v29  }
  0x39   : > { %1265 = vmatmul.msk.f32.gmra.mxu0 %vm532_vm1, %v313_v30  ;;  %1284 = vmatmul.msk.f32.gmra.mxu3 %vm532_vm1, %v332_v31  ;;  %v1115_v30 = vld [vmem:[%s2016_s6 + $0x18] sm:$0xff] }
  0x3e   : > { %474 = vperm.xlu2 %1413, %v360_v32  }
  0x3f   : > { %409 = vperm.xlu1 %1412, %v347_v33   ;;  %404 = vperm.xlu0 %1411, %v346_v34   ;;  %v325_v34 = vld [vmem:[%s2011_s1 + $0x88] sm:$0xff] }
  0x41   : > { %1266 = vmatmul.msk.f32.gmra.mxu0 %vm532_vm1, %v314_v35  ;;  %1285 = vmatmul.msk.f32.gmra.mxu3 %vm532_vm1, %v333_v36 }
  0x46   : > { %399 = vperm.xlu2 %1413, %v345_v37  }
  0x47   : > { %479 = vperm.xlu0 %1411, %v361_v38   ;;  %394 = vperm.xlu1 %1412, %v344_v39  }
  0x49   : > { %1267 = vmatmul.msk.f32.gmra.mxu0 %vm532_vm1, %v315_v40  ;;  %1286 = vmatmul.msk.f32.gmra.mxu3 %vm532_vm1, %v334_v41  ;;  %v326_v40 = vld [vmem:[%s2011_s1 + $0x90] sm:$0xff] }
  0x4e   : > { %384 = vperm.xlu2 %1413, %v342_v42  }
  0x4f   : > { %464 = vperm.xlu0 %1411, %v358_v43   ;;  %469 = vperm.xlu1 %1412, %v359_v44  }
  0x51   : > { %1268 = vmatmul.msk.f32.gmra.mxu0 %vm532_vm1, %v316_v45  ;;  %1287 = vmatmul.msk.f32.gmra.mxu3 %vm532_vm1, %v335_v46 }
  0x56   : > { %459 = vperm.xlu2 %1413, %v357_v47  }
  0x57   : > { %454 = vperm.xlu1 %1412, %v356_v48   ;;  %389 = vperm.xlu0 %1411, %v343_v49  }
  0x59   : > { %1269 = vmatmul.msk.f32.gmra.mxu0 %vm532_vm1, %v317_v50  ;;  %1288 = vmatmul.msk.f32.gmra.mxu3 %vm532_vm1, %v336_v51 }
  0x5e   : > { %898 = vperm.xlu2 %1413, %v824_v52  }
  0x5f   : > { %379 = vperm.xlu1 %1412, %v341_v53   ;;  %374 = vperm.xlu0 %1411, %v340_v54  }
  0x61   : > { %1270 = vmatmul.msk.f32.gmra.mxu0 %vm532_vm1, %v318_v55  ;;  %1289 = vmatmul.msk.f32.gmra.mxu3 %vm532_vm1, %v337_v56 }
  0x66   : > { %893 = vperm.xlu2 %1413, %v823_v57  }
  0x67   : > { %888 = vperm.xlu1 %1412, %v822_v58   ;;  %903 = vperm.xlu0 %1411, %v825_v59  }
  0x68   : > { %v1725_v4 = vpop.permute.xlu2 %514 }
  0x69   : > { %1271 = vmatmul.msk.f32.gmra.mxu0 %vm532_vm1, %v319_v60  ;;  %1290 = vmatmul.msk.f32.gmra.mxu3 %vm532_vm1, %v338_v61 }
  0x6e   : > { %868 = vperm.xlu2 %1413, %v818_v62  }
  0x6f   : > { %883 = vperm.xlu1 %1412, %v821_v63   ;;  %878 = vperm.xlu0 %1411, %v820_v0  }
  0x70   : > { %v1748_v11 = vpop.permute.xlu2 %519 }
  0x71   : > { %1272 = vmatmul.msk.f32.gmra.mxu0 %vm532_vm1, %v320_v1  ;;  %1291 = vmatmul.msk.f32.gmra.mxu3 %vm532_vm1, %v339_v2 }
  0x76   : > { %863 = vperm.xlu2 %1413, %v817_v3  }
  0x77   : > { %858 = vperm.xlu1 %1412, %v816_v5   ;;  %873 = vperm.xlu0 %1411, %v819_v6  }
  0x78   : > { %v1767_v18 = vpop.permute.xlu2 %504 }
  0x79   : > { %1273 = vmatmul.msk.f32.gmra.mxu0 %vm532_vm1, %v321_v7 }
  0x7e   : > { %838 = vperm.xlu2 %1413, %v812_v8  }
  0x7f   : > { %853 = vperm.xlu1 %1412, %v815_v9   ;;  %848 = vperm.xlu0 %1411, %v814_v10  }
  0x80   : > { %v1793_v28 = vpop.permute.xlu2 %429 }
  0x81   : > { %v1750_v12 = vpop.permute.xlu0 %524  ;;  %v1752_v13 = vpop.permute.xlu1 %444  ;;  %1274 = vmatmul.msk.f32.gmra.mxu0 %vm532_vm1, %v322_v14 }
  0x86   : > { %833 = vperm.xlu2 %1413, %v811_v15  }
  0x87   : > { %828 = vperm.xlu1 %1412, %v810_v16   ;;  %843 = vperm.xlu0 %1411, %v813_v17  }
  0x88   : > { %v1810_v36 = vpop.permute.xlu2 %414 }
  0x89   : > { %v1769_v19 = vpop.permute.xlu0 %529  ;;  %v1771_v20 = vpop.permute.xlu1 %449  ;;  %1275 = vmatmul.msk.f32.gmra.mxu0 %vm532_vm1, %v323_v21 }
  0x8e   : > { %1128 = vperm.xlu2 %1413, %v1114_v22   ;;  %v1795_v29 = vpop.f32.mrf.mxu0 }
  0x8f   : > { %1123 = vperm.xlu1 %1412, %v1113_v23   ;;  %1118 = vperm.xlu0 %1411, %v1112_v24  }
  0x90   : > { %v490_v42 = vpop.permute.xlu2 %489 }
  0x91   : > { %v1786_v25 = vpop.permute.xlu1 %439  ;;  %v1788_v26 = vpop.permute.xlu0 %434  ;;  %1276 = vmatmul.msk.f32.gmra.mxu0 %vm532_vm1, %v324_v27 }
  0x94   : > { %v1801_v31 = vpop.f32.mrf.mxu3 }
  0x96   : > { %v653_v35 = vpop.f32.mrf.mxu0 }
  0x97   : > { %1133 = vperm.xlu0 %1411, %v1115_v30  }
  0x98   : > { %v475_v48 = vpop.permute.xlu2 %474 }
  0x99   : > { %v1803_v32 = vpop.permute.xlu0 %509  ;;  %v1805_v33 = vpop.permute.xlu1 %424  ;;  %1277 = vmatmul.msk.f32.gmra.mxu0 %vm532_vm1, %v325_v34 }
  0x9c   : > { %v710_v37 = vpop.f32.mrf.mxu3 }
  0x9d   : > { %v711_v54 = vadd.f32 %v710_v37, %v475_v48 }
  0x9e   : > { %v656_v41 = vpop.f32.mrf.mxu0 }
  0x9f   : > { %v766_v1 = vmax.f32 %v711_v54, 0.0 }
  0xa0   : > { %v400_v59 = vpop.permute.xlu2 %399 }
  0xa1   : > { %v1813_v38 = vpop.permute.xlu0 %494  ;;  %v1815_v39 = vpop.permute.xlu1 %499  ;;  %1278 = vmatmul.msk.f32.gmra.mxu0 %vm532_vm1, %v326_v40 }
  0xa4   : > { %v713_v43 = vpop.f32.mrf.mxu3 }
  0xa6   : > { %v659_v46 = vpop.f32.mrf.mxu0 }
  0xa8   : > { %v385_v16 = vpop.permute.xlu2 %384 }
  0xa9   : > { %v485_v44 = vpop.permute.xlu1 %484  ;;  %v1821_v45 = vpop.permute.xlu0 %419  ;;  %v657_v21 = vadd.f32 %v656_v41, %v385_v16 }
  0xab   : > { %v748_v37 = vmax.f32 %v657_v21, 0.0 }
  0xac   : > { %v716_v47 = vpop.f32.mrf.mxu3 }
  0xad   : > { %v717_v52 = vadd.f32 %v716_v47, %v485_v44 }
  0xae   : > { %v662_v51 = vpop.f32.mrf.mxu0 }
  0xaf   : > { %v768_v55 = vmax.f32 %v717_v52, 0.0 }
  0xb1   : > { %v410_v49 = vpop.permute.xlu1 %409  ;;  %v405_v50 = vpop.permute.xlu0 %404 }
  0xb4   : > { %v719_v53 = vpop.f32.mrf.mxu3 }
  0xb5   : > { %v720_v56 = vadd.f32 %v719_v53, %v490_v42 }
  0xb6   : > { %v665_v63 = vpop.f32.mrf.mxu0 }
  0xb7   : > { %v769_v60 = vmax.f32 %v720_v56, 0.0  ;;  %v666_v0 = vadd.f32 %v665_v63, %v400_v59 }
  0xb9   : > { %v480_v57 = vpop.permute.xlu0 %479  ;;  %v395_v58 = vpop.permute.xlu1 %394  ;;  %v1823_v5 = vpack.c.bf16 %v769_v60, %v768_v55  ;;  %v751_v6 = vmax.f32 %v666_v0, 0.0 }
  0xba   : > { %v714_v61 = vadd.f32 %v713_v43, %v480_v57  ;;  %v663_v62 = vadd.f32 %v662_v51, %v395_v58 }
  0xbc   : > { %v767_v2 = vmax.f32 %v714_v61, 0.0  ;;  %v750_v3 = vmax.f32 %v663_v62, 0.0  ;;  %v722_v8 = vpop.f32.mrf.mxu3 }
  0xbe   : > { %v1825_v7 = vpack.c.bf16 %v767_v2, %v766_v1  ;;  %v1827_v9 = vpack.c.bf16 %v751_v6, %v750_v3  ;;  %v668_v15 = vpop.f32.mrf.mxu0 }
  0xbf   : > { %v669_v22 = vadd.f32 %v668_v15, %v405_v50 }
  0xc1   : > { %v1829_v10 = vpop.permute.xlu0 %464  ;;  %v1831_v14 = vpop.permute.xlu1 %469  ;;  %v752_v42 = vmax.f32 %v669_v22, 0.0 }
  0xc4   : > { %v725_v17 = vpop.f32.mrf.mxu3 }
  0xc6   : > { %v671_v30 = vpop.f32.mrf.mxu0 }
  0xc7   : > { %v672_v34 = vadd.f32 %v671_v30, %v410_v49 }
  0xc9   : > { %v1833_v23 = vpop.permute.xlu1 %454  ;;  %v390_v24 = vpop.permute.xlu0 %389  ;;  %v753_v43 = vmax.f32 %v672_v34, 0.0 }
  0xca   : > { %v660_v27 = vadd.f32 %v659_v46, %v390_v24 }
  0xcb   : > { %v1837_v48 = vpack.c.bf16 %v753_v43, %v752_v42 }
  0xcc   : > { %v749_v40 = vmax.f32 %v660_v27, 0.0  ;;  %v728_v47 = vpop.f32.mrf.mxu3  ;;  %v726_v27 = vadd.f32 %v725_v17, %v1815_v39 }
  0xcd   : > { %v729_v15 = vadd.f32 %v728_v47, %v1767_v18 }
  0xce   : > { %v1835_v44 = vpack.c.bf16 %v749_v40, %v748_v37  ;;  %v674_v50 = vpop.f32.mrf.mxu0  ;;  %v771_v37 = vmax.f32 %v726_v27, 0.0  ;;  %v1373_v27 = vld [vmem:[%s2013_s3 + $0x34] sm:$0xf] }
  0xd1   : > { %v380_v51 = vpop.permute.xlu1 %379  ;;  %v375_v52 = vpop.permute.xlu0 %374 }
  0xd2   : > { %v654_v53 = vadd.f32 %v653_v35, %v380_v51  ;;  %v651_v41 = vadd.f32 %v1795_v29, %v375_v52 }
  0xd4   : > { %v747_v54 = vmax.f32 %v654_v53, 0.0  ;;  %v746_v55 = vmax.f32 %v651_v41, 0.0  ;;  %v731_v49 = vpop.f32.mrf.mxu3 }
  0xd5   : > { %v732_v16 = vadd.f32 %v731_v49, %v1803_v32 }
  0xd6   : > { %v1840_v46 = vpack.c.bf16 %v747_v54, %v746_v55  ;;  %v677_v56 = vpop.f32.mrf.mxu0 }
  0xd7   : > { %v773_v30 = vmax.f32 %v732_v16, 0.0  ;;  %v1312_v16 = vld [vmem:[%s2013_s3 + $0x28] sm:$0xf0] }
  0xdc   : > { %v734_v57 = vpop.f32.mrf.mxu3 }
  0xdd   : > { %v735_v1 = vadd.f32 %v734_v57, %v1725_v4 }
  0xde   : > { %v680_v58 = vpop.f32.mrf.mxu0 }
  0xdf   : > { %v774_v24 = vmax.f32 %v735_v1, 0.0  ;;  %v681_v53 = vadd.f32 %v680_v58, %v1805_v33  ;;  %v708_v33 = vadd.f32 %v1801_v31, %v1831_v14  ;;  %v1368_v31 = vld [vmem:[%s2013_s3 + $0x4] sm:$0xf0]  ;;  %v1304_v1 = vld [vmem:[%s2013_s3 + $0x18] sm:$0xf0] }
  0xe1   : > { %v756_v55 = vmax.f32 %v681_v53, 0.0  ;;  %v1380_v53 = vld [vmem:[%s2013_s3 + $0x64] sm:$0xf0] }
  0xe4   : > { %v737_v59 = vpop.f32.mrf.mxu3 }
  0xe5   : > { %v738_v35 = vadd.f32 %v737_v59, %v1748_v11  ;;  %v772_v11 = vmax.f32 %v729_v15, 0.0  ;;  %v1371_v15 = vld [vmem:[%s2013_s3 + $0x24] sm:$0xf] }
  0xe6   : > { %v683_v60 = vpop.f32.mrf.mxu0 }
  0xe7   : > { %v775_v21 = vmax.f32 %v738_v35, 0.0  ;;  %v807_v40 = vpack.c.bf16 %v773_v30, %v772_v11  ;;  %v684_v47 = vadd.f32 %v683_v60, %v1793_v28  ;;  %v1370_v35 = vld [vmem:[%s2013_s3 + $0x14] sm:$0xf0]  ;;  %v1320_v11 = vld [vmem:[%s2013_s3 + $0x38] sm:$0xf0] }
  0xec   : > { %v740_v61 = vpop.f32.mrf.mxu3 }
  0xed   : > { %v741_v63 = vadd.f32 %v740_v61, %v1750_v12  ;;  %v723_v12 = vadd.f32 %v722_v8, %v1813_v38 }
  0xee   : > { %v686_v62 = vpop.f32.mrf.mxu0 }
  0xef   : > { %v776_v2 = vmax.f32 %v741_v63, 0.0  ;;  %v770_v4 = vmax.f32 %v723_v12, 0.0  ;;  %v687_v39 = vadd.f32 %v686_v62, %v1788_v26  ;;  %v675_v26 = vadd.f32 %v674_v50, %v1810_v36  ;;  %v1294_v63 = vld [vmem:[%s2013_s3] sm:$0xf]  ;;  %v1374_v12 = vld [vmem:[%s2013_s3 + $0x34] sm:$0xf0] }
  0xf0   : > { %v765_v36 = vmax.f32 %v708_v33, 0.0 }
  0xf1   : > { %v806_v18 = vpack.c.bf16 %v771_v37, %v770_v4  ;;  %v758_v41 = vmax.f32 %v687_v39, 0.0  ;;  %v754_v28 = vmax.f32 %v675_v26, 0.0  ;;  %v1376_v4 = vld [vmem:[%s2013_s3 + $0x44] sm:$0xf0]  ;;  %v1375_v37 = vld [vmem:[%s2013_s3 + $0x44] sm:$0xf] }
  0xf2   : > { %v1336_v39 = vld [vmem:[%s2013_s3 + $0x58] sm:$0xf0] }
  0xf4   : > { %v743_v0 = vpop.f32.mrf.mxu3 }
  0xf5   : > { %v744_v29 = vadd.f32 %v743_v0, %v1769_v19  ;;  %v808_v19 = vpack.c.bf16 %v775_v21, %v774_v24  ;;  %v1318_v24 = vld [vmem:[%s2013_s3 + $0x30] sm:$0xf] }
  0xf6   : > { %v689_v6 = vpop.f32.mrf.mxu0  ;;  %v1319_v30 = vor.u32 %v1374_v12, %v1318_v24 }
  0xf7   : > { %v777_v3 = vmax.f32 %v744_v29, 0.0  ;;  %v690_v43 = vadd.f32 %v689_v6, %v1786_v25  ;;  %v678_v25 = vadd.f32 %v677_v56, %v1821_v45  ;;  %v1369_v29 = vld [vmem:[%s2013_s3 + $0x14] sm:$0xf]  ;;  %v1372_v6 = vld [vmem:[%s2013_s3 + $0x24] sm:$0xf0] }
  0xf9   : > { %v809_v22 = vpack.c.bf16 %v777_v3, %v776_v2  ;;  %v759_v51 = vmax.f32 %v690_v43, 0.0  ;;  %v1307_v2 = vor.u32 %v1369_v29, %v1304_v1  ;;  %v1310_v3 = vld [vmem:[%s2013_s3 + $0x20] sm:$0xf]  ;;  %v1378_v43 = vld [vmem:[%s2013_s3 + $0x54] sm:$0xf0] }
  0xfa   : > { %v1311_v21 = vor.u32 %v1372_v6, %v1310_v3 }
  0xfb   : > { %1035 = vmatpush.bf16.msra.mxu2 %v809_v22  ;;  %v800_v54 = vpack.c.bf16 %v759_v51, %v758_v41  ;;  %v1315_v22 = vor.u32 %v1371_v15, %v1312_v16  ;;  %v1342_v51 = vld [vmem:[%s2013_s3 + $0x60] sm:$0xf]  ;;  %v1379_v41 = vld [vmem:[%s2013_s3 + $0x64] sm:$0xf] }
  0xfe   : > { %v692_v34 = vpop.f32.mrf.mxu0 }
  0xff   : > { %1036 = vmatpush.bf16.msra.mxu2 %v808_v19  ;;  %v693_v32 = vadd.f32 %v692_v34, %v1752_v13  ;;  %v1323_v19 = vor.u32 %v1373_v27, %v1320_v11  ;;  %v1326_v34 = vld [vmem:[%s2013_s3 + $0x40] sm:$0xf] }
 0x101   : > { %v760_v8 = vmax.f32 %v693_v32, 0.0 }
 0x103   : > { %1037 = vmatpush.bf16.msra.mxu2 %v807_v40  ;;  %v1328_v40 = vld [vmem:[%s2013_s3 + $0x48] sm:$0xf0] }
 0x104   : > { %v1331_v32 = vor.u32 %v1375_v37, %v1328_v40 }
 0x106   : > { %v695_v42 = vpop.f32.mrf.mxu0 }
 0x107   : > { %1038 = vmatpush.bf16.msra.mxu2 %v806_v18  ;;  %v696_v38 = vadd.f32 %v695_v42, %v1771_v20  ;;  %v757_v20 = vmax.f32 %v684_v47, 0.0  ;;  %v1327_v18 = vor.u32 %v1376_v4, %v1326_v34  ;;  %v1334_v42 = vld [vmem:[%s2013_s3 + $0x50] sm:$0xf] }
 0x109   : > { %v761_v17 = vmax.f32 %v696_v38, 0.0  ;;  %v799_v49 = vpack.c.bf16 %v757_v20, %v756_v55  ;;  %v1377_v38 = vld [vmem:[%s2013_s3 + $0x54] sm:$0xf]  ;;  %v1350_v55 = vld [vmem:[%s2013_s3 + $0x70] sm:$0xf] }
 0x10b   : > { %1039 = vmatpush.bf16.msra.mxu2 %v1823_v5  ;;  %v801_v52 = vpack.c.bf16 %v761_v17, %v760_v8  ;;  %v755_v5 = vmax.f32 %v678_v25, 0.0  ;;  %v1335_v8 = vor.u32 %v1378_v43, %v1334_v42  ;;  %v1339_v17 = vor.u32 %v1377_v38, %v1336_v39 }
 0x10c   : > { %v1343_v25 = vor.u32 %v1380_v53, %v1342_v51 }
 0x10d   : > { %986 = vmatpush.bf16.msra.mxu1 %v801_v52  ;;  %v798_v59 = vpack.c.bf16 %v755_v5, %v754_v28  ;;  %v1945_v52 = vpop.permute.xlu1 %888  ;;  %v1382_v5 = vld [vmem:[%s2013_s3 + $0x74] sm:$0xf0]  ;;  %v1352_v28 = vld [vmem:[%s2013_s3 + $0x78] sm:$0xf0] }
 0x10e   : > { %v698_v13 = vpop.f32.mrf.mxu0 }
 0x10f   : > { %1040 = vmatpush.bf16.msra.mxu2 %v1825_v7  ;;  %v460_v7 = vpop.permute.xlu2 %459  ;;  %v699_v50 = vadd.f32 %v698_v13, %v1833_v23  ;;  %v1344_v13 = vld [vmem:[%s2013_s3 + $0x68] sm:$0xf0] }
 0x110   : > { %v1347_v20 = vor.u32 %v1379_v41, %v1344_v13 }
 0x111   : > { %987 = vmatpush.bf16.msra.mxu1 %v800_v54  ;;  %v762_v14 = vmax.f32 %v699_v50, 0.0 }
 0x115   : > { %988 = vmatpush.bf16.msra.mxu1 %v799_v49  ;;  %v1958_v26 = vpop.permute.xlu1 %883  ;;  %v1381_v49 = vld [vmem:[%s2013_s3 + $0x74] sm:$0xf] }
 0x116   : > { %v701_v57 = vpop.f32.mrf.mxu0  ;;  %v1355_v33 = vor.u32 %v1381_v49, %v1352_v28 }
 0x117   : > { %v702_v56 = vadd.f32 %v701_v57, %v460_v7  ;;  %v1940_v47 = vpop.permute.xlu2 %898 }
 0x119   : > { %989 = vmatpush.bf16.msra.mxu1 %v798_v59  ;;  %v763_v61 = vmax.f32 %v702_v56, 0.0  ;;  %v1351_v59 = vor.u32 %v1382_v5, %v1350_v55 }
 0x11b   : > { %v802_v23 = vpack.c.bf16 %v763_v61, %v762_v14 }
 0x11d   : > { %990 = vmatpush.bf16.msra.mxu1 %v1837_v48  ;;  %v1295_v48 = vor.u32 %v1368_v31, %v1294_v63  ;;  %v859_v7 = vpop.permute.xlu1 %858 }
 0x11e   : > { %v704_v45 = vpop.f32.mrf.mxu0 }
 0x11f   : > { %v705_v58 = vadd.f32 %v704_v45, %v1829_v10  ;;  %v1367_v10 = vld [vmem:[%s2013_s3 + $0x4] sm:$0xf]  ;;  %v1956_v54 = vpop.permute.xlu2 %893  ;;  %v1972_v45 = vpop.permute.xlu0 %903 }
 0x121   : > { %v764_v60 = vmax.f32 %v705_v58, 0.0  ;;  %991 = vmatpush.bf16.msra.mxu1 %v1827_v9  ;;  %v1296_v9 = vld [vmem:[%s2013_s3 + $0x8] sm:$0xf0] }
 0x122   : > { %v1299_v0 = vor.u32 %v1367_v10, %v1296_v9 }
 0x123   : > { %v803_v62 = vpack.c.bf16 %v765_v36, %v764_v60 }
 0x125   : > { %992 = vmatpush.bf16.msra.mxu1 %v1835_v44  ;;  %1041 = vmatpush.bf16.msra.mxu2 %v803_v62  ;;  %v1302_v44 = vld [vmem:[%s2013_s3 + $0x10] sm:$0xf]  ;;  %v854_v58 = vpop.permute.xlu1 %853 }
 0x127   : > { %v869_v57 = vpop.permute.xlu2 %868  ;;  %v1974_v36 = vpop.permute.xlu0 %878 }
 0x129   : > { %993 = vmatpush.bf16.msra.mxu1 %v1840_v46  ;;  %1042 = vmatpush.bf16.msra.mxu2 %v802_v23  ;;  %v1303_v46 = vor.u32 %v1370_v35, %v1302_v44 }
 0x12c   : > { %994 = vmatmul.bf16.vlgmr.msra.gmra.mxu1 %v1295_v48  ;;  %1043 = vmatmul.bf16.vlgmr.msra.gmra.mxu2 %v1299_v0 }
 0x12d   : > { %v829_v61 = vpop.permute.xlu1 %828 }
 0x12f   : > { %v864_v56 = vpop.permute.xlu2 %863  ;;  %v1976_v14 = vpop.permute.xlu0 %873 }
 0x137   : > { %v839_v60 = vpop.permute.xlu2 %838  ;;  %v849_v1 = vpop.permute.xlu0 %848 }
 0x13c   : > { %999 = vmatmul.bf16.gmra.mxu1 %v1303_v46  ;;  %1048 = vmatmul.bf16.gmra.mxu2 %v1307_v2 }
 0x13f   : > { %v834_v9 = vpop.permute.xlu2 %833  ;;  %v844_v16 = vpop.permute.xlu0 %843 }
 0x14c   : > { %1004 = vmatmul.bf16.gmra.mxu1 %v1311_v21  ;;  %1053 = vmatmul.bf16.gmra.mxu2 %v1315_v22 }
 0x15c   : > { %1009 = vmatmul.bf16.gmra.mxu1 %v1319_v30  ;;  %1058 = vmatmul.bf16.gmra.mxu2 %v1323_v19 }
 0x16c   : > { %1014 = vmatmul.bf16.gmra.mxu1 %v1327_v18  ;;  %1063 = vmatmul.bf16.gmra.mxu2 %v1331_v32 }
 0x17c   : > { %1019 = vmatmul.bf16.gmra.mxu1 %v1335_v8  ;;  %1068 = vmatmul.bf16.gmra.mxu2 %v1339_v17 }
 0x18c   : > { %1024 = vmatmul.bf16.gmra.mxu1 %v1343_v25  ;;  %1073 = vmatmul.bf16.gmra.mxu2 %v1347_v20 }
 0x19c   : > { %1029 = vmatmul.bf16.gmra.mxu1 %v1351_v59  ;;  %1078 = vmatmul.bf16.gmra.mxu2 %v1355_v33 }
 0x1a9   : > { %v995_v50 = vpop.f32.mrf.mxu1 }
 0x1aa   : > { %v996_v62 = vadd.f32 %v995_v50, %v829_v61 }
 0x1af   : > { %v1044_v63 = vpop.f32.mrf.mxu2 }
 0x1b0   : > { %v1045_v31 = vadd.f32 %v1044_v63, %v996_v62 }
 0x1b1   : > { %v997_v10 = vpop.f32.mrf.mxu1 }
 0x1b2   : > { %v998_v23 = vadd.f32 %v997_v10, %v834_v9  ;;  %v1084_v35 = vmax.f32 %v1045_v31, 0.0 }
 0x1b7   : > { %v1046_v48 = vpop.f32.mrf.mxu2 }
 0x1b8   : > { %v1047_v0 = vadd.f32 %v1046_v48, %v998_v23 }
 0x1b9   : > { %v1000_v44 = vpop.f32.mrf.mxu1 }
 0x1ba   : > { %v1085_v29 = vmax.f32 %v1047_v0, 0.0  ;;  %v1001_v2 = vadd.f32 %v1000_v44, %v839_v60 }
 0x1bc   : > { %v1978_v46 = vpack.c.bf16 %v1085_v29, %v1084_v35 }
 0x1bf   : > { %v1049_v3 = vpop.f32.mrf.mxu2 }
 0x1c0   : > { %v1050_v6 = vadd.f32 %v1049_v3, %v1001_v2 }
 0x1c1   : > { %v1002_v15 = vpop.f32.mrf.mxu1 }
 0x1c2   : > { %v1003_v21 = vadd.f32 %v1002_v15, %v844_v16  ;;  %v1086_v27 = vmax.f32 %v1050_v6, 0.0 }
 0x1c7   : > { %v1051_v22 = vpop.f32.mrf.mxu2 }
 0x1c8   : > { %v1052_v24 = vadd.f32 %v1051_v22, %v1003_v21 }
 0x1c9   : > { %v1005_v12 = vpop.f32.mrf.mxu1 }
 0x1ca   : > { %v1087_v11 = vmax.f32 %v1052_v24, 0.0  ;;  %v1006_v19 = vadd.f32 %v1005_v12, %v849_v1 }
 0x1cc   : > { %v1980_v30 = vpack.c.bf16 %v1087_v11, %v1086_v27 }
 0x1cf   : > { %v1054_v34 = vpop.f32.mrf.mxu2 }
 0x1d0   : > { %v1055_v4 = vadd.f32 %v1054_v34, %v1006_v19 }
 0x1d1   : > { %v1007_v37 = vpop.f32.mrf.mxu1 }
 0x1d2   : > { %v1008_v40 = vadd.f32 %v1007_v37, %v854_v58  ;;  %v1088_v43 = vmax.f32 %v1055_v4, 0.0 }
 0x1d7   : > { %v1056_v18 = vpop.f32.mrf.mxu2 }
 0x1d8   : > { %v1057_v32 = vadd.f32 %v1056_v18, %v1008_v40  ;;  %v1119_v18 = vpop.permute.xlu0 %1118 }
 0x1d9   : > { %v1010_v42 = vpop.f32.mrf.mxu1 }
 0x1da   : > { %v1089_v38 = vmax.f32 %v1057_v32, 0.0  ;;  %v1011_v8 = vadd.f32 %v1010_v42, %v859_v7  ;;  %v1124_v42 = vpop.permute.xlu1 %1123 }
 0x1dc   : > { %v1106_v39 = vpack.c.bf16 %v1089_v38, %v1088_v43 }
 0x1df   : > { %v1059_v17 = vpop.f32.mrf.mxu2 }
 0x1e0   : > { %v1060_v51 = vadd.f32 %v1059_v17, %v1011_v8  ;;  %v1134_v17 = vpop.permute.xlu0 %1133 }
 0x1e1   : > { %v1012_v53 = vpop.f32.mrf.mxu1 }
 0x1e2   : > { %v1013_v41 = vadd.f32 %v1012_v53, %v864_v56  ;;  %v1090_v55 = vmax.f32 %v1060_v51, 0.0 }
 0x1e7   : > { %v1061_v13 = vpop.f32.mrf.mxu2 }
 0x1e8   : > { %v1062_v25 = vadd.f32 %v1061_v13, %v1013_v41 }
 0x1e9   : > { %v1015_v20 = vpop.f32.mrf.mxu1 }
 0x1ea   : > { %v1091_v5 = vmax.f32 %v1062_v25, 0.0  ;;  %v1016_v28 = vadd.f32 %v1015_v20, %v869_v57 }
 0x1ec   : > { %v1107_v49 = vpack.c.bf16 %v1091_v5, %v1090_v55 }
 0x1ef   : > { %v1064_v59 = vpop.f32.mrf.mxu2 }
 0x1f0   : > { %v1065_v33 = vadd.f32 %v1064_v59, %v1016_v28 }
 0x1f1   : > { %v1017_v58 = vpop.f32.mrf.mxu1 }
 0x1f2   : > { %v1092_v37 = vmax.f32 %v1065_v33, 0.0 }
 0x1f7   : > { %v1066_v50 = vpop.f32.mrf.mxu2 }
 0x1f9   : > { %v1020_v60 = vpop.f32.mrf.mxu1 }
 0x1fa   : > { %v1021_v22 = vadd.f32 %v1020_v60, %v1974_v36  ;;  %v1383_v36 = vld [vmem:[%s2015_s5] sm:$0xff] }
 0x1ff   : > { %v1069_v61 = vpop.f32.mrf.mxu2 }
 0x200   : > { %v1070_v27 = vadd.f32 %v1069_v61, %v1021_v22 }
 0x201   : > { %v1022_v62 = vpop.f32.mrf.mxu1 }
 0x202   : > { %v1023_v6 = vadd.f32 %v1022_v62, %v1958_v26  ;;  %v1094_v34 = vmax.f32 %v1070_v27, 0.0 }
 0x207   : > { %v1071_v63 = vpop.f32.mrf.mxu2 }
 0x208   : > { %v1072_v24 = vadd.f32 %v1071_v63, %v1023_v6 }
 0x209   : > { %v1025_v7 = vpop.f32.mrf.mxu1 }
 0x20a   : > { %v1026_v1 = vadd.f32 %v1025_v7, %v1945_v52  ;;  %v1095_v19 = vmax.f32 %v1072_v24, 0.0 }
 0x20c   : > { %v1109_v4 = vpack.c.bf16 %v1095_v19, %v1094_v34 }
 0x20f   : > { %v1074_v31 = vpop.f32.mrf.mxu2 }
 0x210   : > { %v1075_v15 = vadd.f32 %v1074_v31, %v1026_v1 }
 0x211   : > { %v1027_v10 = vpop.f32.mrf.mxu1 }
 0x212   : > { %v1028_v44 = vadd.f32 %v1027_v10, %v1956_v54  ;;  %v1018_v54 = vadd.f32 %v1017_v58, %v1976_v14  ;;  %v1096_v11 = vmax.f32 %v1075_v15, 0.0  ;;  %v1384_v14 = vld [vmem:[%s2015_s5 + $0x8] sm:$0xff] }
 0x217   : > { %v1076_v9 = vpop.f32.mrf.mxu2 }
 0x218   : > { %v1077_v2 = vadd.f32 %v1076_v9, %v1028_v44 }
 0x219   : > { %v1030_v56 = vpop.f32.mrf.mxu1 }
 0x21a   : > { %v1031_v0 = vadd.f32 %v1030_v56, %v1940_v47  ;;  %v1097_v12 = vmax.f32 %v1077_v2, 0.0 }
 0x21c   : > { %v1110_v52 = vpack.c.bf16 %v1097_v12, %v1096_v11 }
 0x21f   : > { %v1079_v23 = vpop.f32.mrf.mxu2 }
 0x220   : > { %v1080_v57 = vadd.f32 %v1079_v23, %v1031_v0 }
 0x221   : > { %v1032_v48 = vpop.f32.mrf.mxu1 }
 0x222   : > { %v1033_v35 = vadd.f32 %v1032_v48, %v1972_v45  ;;  %v1098_v16 = vmax.f32 %v1080_v57, 0.0  ;;  %v1067_v45 = vadd.f32 %v1066_v50, %v1018_v54 }
 0x224   : > { %v1093_v26 = vmax.f32 %v1067_v45, 0.0 }
 0x226   : > { %v1108_v40 = vpack.c.bf16 %v1093_v26, %v1092_v37 }
 0x227   : > { %v1081_v29 = vpop.f32.mrf.mxu2 }
 0x228   : > { %v1082_v3 = vadd.f32 %v1081_v29, %v1033_v35 }
 0x22a   : > { %v1099_v21 = vmax.f32 %v1082_v3, 0.0 }
 0x22c   : > { %v1111_v47 = vpack.c.bf16 %v1099_v21, %v1098_v16 }
 0x22e   : > { %1148 = vmatpush.bf16.msrb.mxu3 %v1111_v47 }
 0x232   : > { %1149 = vmatpush.bf16.msrb.mxu3 %v1110_v52 }
 0x236   : > { %1150 = vmatpush.bf16.msrb.mxu3 %v1109_v4 }
 0x23a   : > { %1151 = vmatpush.bf16.msrb.mxu3 %v1108_v40 }
 0x23e   : > { %1152 = vmatpush.bf16.msrb.mxu3 %v1107_v49 }
 0x242   : > { %1153 = vmatpush.bf16.msrb.mxu3 %v1106_v39 }
 0x246   : > { %1154 = vmatpush.bf16.msrb.mxu3 %v1980_v30 }
 0x24a   : > { %1155 = vmatpush.bf16.msrb.mxu3 %v1978_v46  ;;  %v1129_v46 = vpop.permute.xlu2 %1128 }
 0x24d   : > { %1156 = vmatmul.bf16.vlgmr.msrb.gmra.mxu3 %v1383_v36 }
 0x25d   : > { %1161 = vmatmul.bf16.gmra.mxu3 %v1384_v14 }
 0x2d0   : > { %v1157_v32 = vpop.f32.mrf.mxu3 }
 0x2d1   : > { %v1158_v30 = vadd.f32 %v1157_v32, %v1119_v18 }
 0x2d3   : > { %1167 = vst [vmem:[%s306_s20] sm:$0xff] %v1158_v30 }
 0x2d8   : > { %v1159_v43 = vpop.f32.mrf.mxu3 }
 0x2d9   : > { %v1160_v38 = vadd.f32 %v1159_v43, %v1124_v42 }
 0x2db   : > { %1168 = vst [vmem:[%s306_s20 + $0x8] sm:$0xff] %v1160_v38 }
 0x2e0   : > { %v1162_v39 = vpop.f32.mrf.mxu3 }
 0x2e1   : > { %v1163_v8 = vadd.f32 %v1162_v39, %v1129_v46 }
 0x2e3   : > { %1169 = vst [vmem:[%s306_s20 + $0x10] sm:$0xff] %v1163_v8 }
 0x2e8   : > { %v1164_v51 = vpop.f32.mrf.mxu3 }
 0x2e9   : > { %v1165_v53 = vadd.f32 %v1164_v51, %v1134_v17 }
 0x2eb   : > { %1170 = vst [vmem:[%s306_s20 + $0x18] sm:$0xff] %v1165_v53 }
 0x2ec PF: > { %s17_s26 = sadd.s32 1, %s1436_s26   ;;  %s2018_s24 = smov %s1432_s25 }
 0x2ed   : > { %p14_p5 = scmp.ge.s32.totalorder %s17_s26, 4   ;;  %s2019_s25 = smov %s2021_s27 }
 0x2ef   :  { %16 = sbr.rel (!%p14_p5) target bundleno = 2 (0x2), region = 78 }

</bundles_post_ra>
